<compile_context>
chip_gen: v6e
topology: v6e:2x2x1
jax: 0.10.0
libtpu: 0.0.40
codegen_flags: <defaults>
</compile_context>

<pallas_src>
import functools

import jax
import jax.numpy as jnp
from jax import lax
from jax.experimental import pallas as pl
from jax.experimental.pallas import tpu as pltpu


def _round_up(x, m):
    return ((x + m - 1) // m) * m


def _cdiv(a, b):
    return -(-a // b)


def _maybe_pad2d(a, rows, cols):
    pr = rows - a.shape[0]
    pc = cols - a.shape[1]
    if pr == 0 and pc == 0:
        return a
    return jnp.pad(a, ((0, pr), (0, pc)))


def _invariant_spec(shape, index_map):
    """BlockSpec for a grid-invariant operand: single-buffered (no 2x VMEM)."""
    try:
        return pl.BlockSpec(shape, index_map, pipeline_mode=pl.Buffered(1))
    except Exception:  # older jax without pipeline_mode: default double-buffer
        return pl.BlockSpec(shape, index_map)


_SQRT1_2 = 0.7071067811865476


def _gelu_linear2(x, w1, b1, w2, precision):
    """GELU(x @ w1 + b1) @ w2 with f32 accumulation on the MXU."""
    h = jnp.dot(x, w1, preferred_element_type=jnp.float32, precision=precision)
    h = h + b1.astype(jnp.float32)
    # Exact erf-based GELU (matches torch.nn.GELU() default). Dropout(p=0)=id.
    h = 0.5 * h * (1.0 + lax.erf(h * jnp.float32(_SQRT1_2)))
    return jnp.dot(h.astype(x.dtype), w2,
                   preferred_element_type=jnp.float32, precision=precision)


def _ffn_kernel_single(x_ref, w1_ref, b1_ref, w2_ref, b2_ref, o_ref, *, precision):
    o = _gelu_linear2(x_ref[...], w1_ref[...], b1_ref[...], w2_ref[...], precision)
    o_ref[...] = (o + b2_ref[...].astype(jnp.float32)).astype(o_ref.dtype)


def _ffn_kernel_chunked(x_ref, w1_ref, b1_ref, w2_ref, b2_ref, o_ref, acc_ref,
                        *, precision):
    k = pl.program_id(1)

    @pl.when(k == 0)
    def _():
        acc_ref[...] = jnp.zeros_like(acc_ref)

    acc_ref[...] += _gelu_linear2(x_ref[...], w1_ref[...], b1_ref[...],
                                  w2_ref[...], precision)

    @pl.when(k == pl.num_programs(1) - 1)
    def _():
        o_ref[...] = (acc_ref[...] + b2_ref[...].astype(jnp.float32)
                      ).astype(o_ref.dtype)


@functools.partial(jax.jit, static_argnames=("token_tile", "hidden_tile"))
def feed_forward(x, w1, b1, w2, b2, *, token_tile=None, hidden_tile=None):
    """x: (batch, seq, dim). Weights stored as (in_features, out_features)."""
    B, S, dim = x.shape
    hidden = w1.shape[1]
    tokens = B * S

    act_bytes = x.dtype.itemsize
    w_bytes = w1.dtype.itemsize

    # Generation-aware VMEM capacity (v5e/v6e: 128 MiB, v7x: 64 MiB per TC).
    try:
        vmem_cap = int(pltpu.get_tpu_info().vmem_capacity_bytes)
    except Exception:
        vmem_cap = 64 * 1024 * 1024  # conservative fallback

    # ---------------- tiling decisions (trace-time Python ints) --------------
    dim_p = _round_up(dim, 128)                       # lane-dense features

    if token_tile is None:
        token_tile = 512 if vmem_cap >= (100 << 20) else 256
    tm = min(_round_up(token_tile, 8), _round_up(tokens, 8))
    tokens_p = _round_up(tokens, 8)                   # sublane-align rows only
    # Keep >= 2 token tiles so the "parallel" axis can shard across 2 TCs.
    if tokens > 8 and _cdiv(tokens_p, tm) < 2:
        tm = max(8, _round_up(_cdiv(tokens, 2), 8))
    grid_m = _cdiv(tokens_p, tm)                      # edge block allowed

    hidden_p = _round_up(hidden, 128)
    if hidden_tile is None:
        # Fully-resident (single-buffered) weights + f32 hidden activation.
        resident = (2 * dim_p * hidden_p + hidden_p + dim_p) * w_bytes \
                   + tm * hidden_p * 4
        tk = hidden_p if resident <= int(0.35 * vmem_cap) else 512
    else:
        tk = min(_round_up(hidden_tile, 128), hidden_p)
    chunked = tk < hidden_p
    hidden_pad = _round_up(hidden_p, tk) if chunked else hidden_p

    precision = lax.Precision.HIGHEST if x.dtype == jnp.float32 else None

    # ---------------- operand padding (skipped when already aligned) ---------
    x2d = _maybe_pad2d(x.reshape(tokens, dim), tokens_p, dim_p)
    w1_p = _maybe_pad2d(w1, dim_p, hidden_pad)
    b1_p = _maybe_pad2d(b1.reshape(1, hidden), 1, hidden_pad)
    w2_p = _maybe_pad2d(w2, hidden_pad, dim_p)
    b2_p = _maybe_pad2d(b2.reshape(1, dim), 1, dim_p)

    # ---------------- specs / kernel selection --------------------------------
    if chunked:
        nk = hidden_pad // tk
        grid = (grid_m, nk)
        in_specs = [
            pl.BlockSpec((tm, dim_p), lambda i, k: (i, 0)),      # x tile
            pl.BlockSpec((dim_p, tk), lambda i, k: (0, k)),      # w1 chunk
            pl.BlockSpec((1, tk), lambda i, k: (0, k)),          # b1 chunk
            pl.BlockSpec((tk, dim_p), lambda i, k: (k, 0)),      # w2 chunk
            _invariant_spec((1, dim_p), lambda i, k: (0, 0)),    # b2 (resident)
        ]
        out_specs = pl.BlockSpec((tm, dim_p), lambda i, k: (i, 0))
        scratch_shapes = [pltpu.VMEM((tm, dim_p), jnp.float32)]
        kernel = functools.partial(_ffn_kernel_chunked, precision=precision)
        dims = ("parallel", "arbitrary")
        weight_buf = (2 * (dim_p * tk + tk * dim_p + tk) + dim_p) * w_bytes
        inter = tm * tk * 4 + tm * dim_p * 4 + tm * tk * act_bytes
        scratch_bytes = tm * dim_p * 4
        weight_fetches = grid_m
    else:
        grid = (grid_m,)
        in_specs = [
            pl.BlockSpec((tm, dim_p), lambda i: (i, 0)),              # x tile
            _invariant_spec((dim_p, hidden_p), lambda i: (0, 0)),     # w1
            _invariant_spec((1, hidden_p), lambda i: (0, 0)),         # b1
            _invariant_spec((hidden_p, dim_p), lambda i: (0, 0)),     # w2
            _invariant_spec((1, dim_p), lambda i: (0, 0)),            # b2
        ]
        out_specs = pl.BlockSpec((tm, dim_p), lambda i: (i, 0))
        scratch_shapes = []
        kernel = functools.partial(_ffn_kernel_single, precision=precision)
        dims = ("parallel",)
        # Single-buffered (Buffered(1)) resident weights/biases: no 2x factor.
        weight_buf = (dim_p * hidden_p + hidden_p * dim_p
                      + hidden_p + dim_p) * w_bytes
        inter = tm * hidden_p * 4 + tm * dim_p * 4 + tm * hidden_p * act_bytes
        scratch_bytes = 0
        weight_fetches = 1

    vmem_needed = (2 * tm * dim_p * act_bytes          # x tile (double-buffered)
                   + 2 * tm * dim_p * act_bytes        # out tile
                   + weight_buf + inter + scratch_bytes)
    vmem_limit = int(min(int(0.85 * vmem_cap),
                         max(32 * 1024 * 1024, int(1.5 * vmem_needed))))

    cost = pl.CostEstimate(
        flops=4 * tokens_p * dim_p * hidden_pad,
        transcendentals=tokens_p * hidden_pad,
        bytes_accessed=(
            x2d.size * act_bytes
            + (w1_p.size + w2_p.size + b1_p.size + b2_p.size) * w_bytes
            * weight_fetches
            + tokens_p * dim_p * act_bytes
        ),
    )

    out2d = pl.pallas_call(
        kernel,
        out_shape=jax.ShapeDtypeStruct((tokens_p, dim_p), x.dtype),
        grid_spec=pltpu.PrefetchScalarGridSpec(
            num_scalar_prefetch=0,
            grid=grid,
            in_specs=in_specs,
            out_specs=out_specs,
            scratch_shapes=scratch_shapes,
        ),
        compiler_params=pltpu.CompilerParams(
            dimension_semantics=dims,
            vmem_limit_bytes=vmem_limit,
        ),
        cost_estimate=cost,
    )(x2d, w1_p, b1_p, w2_p, b2_p)

    return out2d[:tokens, :dim].reshape(B, S, dim)


def _reference(x, w1, b1, w2, b2):
    h = jnp.einsum("bsd,dh->bsh", x, w1, precision="highest") + b1
    h = 0.5 * h * (1.0 + lax.erf(h * jnp.float32(_SQRT1_2)))
    return jnp.einsum("bsh,hd->bsd", h, w2, precision="highest") + b2


if __name__ == "__main__":
    # Small shapes consistent with the module: batch=2, seq=8, dim=32, hidden=64
    B, S, DIM, HIDDEN = 2, 8, 32, 64

    key = jax.random.PRNGKey(0)
    kx, kw1, kb1, kw2, kb2 = jax.random.split(key, 5)

    x = jax.random.normal(kx, (B, S, DIM), dtype=jnp.float32)
    # nn.Linear weights stored (in_features, out_features) = PyTorch weight.T
    w1 = jax.random.normal(kw1, (DIM, HIDDEN), dtype=jnp.float32) * (1.0 / DIM ** 0.5)
    b1 = jax.random.normal(kb1, (HIDDEN,), dtype=jnp.float32) * 0.01
    w2 = jax.random.normal(kw2, (HIDDEN, DIM), dtype=jnp.float32) * (1.0 / HIDDEN ** 0.5)
    b2 = jax.random.normal(kb2, (DIM,), dtype=jnp.float32) * 0.01

    out = jax.block_until_ready(feed_forward(x, w1, b1, w2, b2))
    ref = _reference(x, w1, b1, w2, b2)
    assert out.shape == (B, S, DIM)
    assert jnp.allclose(out, ref, atol=1e-4, rtol=1e-4), "mismatch (single path)"

    # Also exercise the hidden-chunked accumulator path (still tiny shapes).
    B2, S2, DIM2, HIDDEN2 = 2, 8, 64, 256
    k2 = jax.random.split(jax.random.PRNGKey(0), 5)
    x2 = jax.random.normal(k2[0], (B2, S2, DIM2), dtype=jnp.float32)
    w1b = jax.random.normal(k2[1], (DIM2, HIDDEN2), jnp.float32) * (1.0 / DIM2 ** 0.5)
    b1b = jax.random.normal(k2[2], (HIDDEN2,), jnp.float32) * 0.01
    w2b = jax.random.normal(k2[3], (HIDDEN2, DIM2), jnp.float32) * (1.0 / HIDDEN2 ** 0.5)
    b2b = jax.random.normal(k2[4], (DIM2,), jnp.float32) * 0.01

    out2 = jax.block_until_ready(
        feed_forward(x2, w1b, b1b, w2b, b2b, hidden_tile=128))
    ref2 = _reference(x2, w1b, b1b, w2b, b2b)
    assert jnp.allclose(out2, ref2, atol=1e-4, rtol=1e-4), "mismatch (chunked path)"

    print("KERNEL_OK")
</pallas_src>

<mosaic_0001>
module attributes {stable_mosaic.version = 11 : i64} {
  func.func @_ffn_kernel_single(%arg0: i32, %arg1: memref<8x128xf32, #tpu.memory_space<vmem>>, %arg2: memref<128x128xf32, #tpu.memory_space<vmem>>, %arg3: memref<1x128xf32, #tpu.memory_space<vmem>>, %arg4: memref<128x128xf32, #tpu.memory_space<vmem>>, %arg5: memref<1x128xf32, #tpu.memory_space<vmem>>, %arg6: memref<8x128xf32, #tpu.memory_space<vmem>>) attributes {dimension_semantics = [#tpu.dimension_semantics<parallel>], iteration_bounds = array<i64: 2>, scalar_prefetch = 0 : i64, scratch_operands = 0 : i64, tpu.core_type = #tpu.core_type<tc>, window_params = [{transform_indices = @transform_0, window_bounds = array<i64: 8, 128>}, {pipeline_mode = #tpu.pipeline_mode<synchronous>, transform_indices = @transform_1, window_bounds = array<i64: 128, 128>}, {pipeline_mode = #tpu.pipeline_mode<synchronous>, transform_indices = @transform_2, window_bounds = array<i64: 1, 128>}, {pipeline_mode = #tpu.pipeline_mode<synchronous>, transform_indices = @transform_3, window_bounds = array<i64: 128, 128>}, {pipeline_mode = #tpu.pipeline_mode<synchronous>, transform_indices = @transform_4, window_bounds = array<i64: 1, 128>}, {transform_indices = @transform_5, window_bounds = array<i64: 8, 128>}]} {
    %c0 = arith.constant 0 : index
    %c0_0 = arith.constant 0 : index
    %0 = vector.load %arg1[%c0, %c0_0] : memref<8x128xf32, #tpu.memory_space<vmem>>, vector<8x128xf32>
    %c0_1 = arith.constant 0 : index
    %c0_2 = arith.constant 0 : index
    %1 = vector.load %arg2[%c0_1, %c0_2] : memref<128x128xf32, #tpu.memory_space<vmem>>, vector<128x128xf32>
    %c0_3 = arith.constant 0 : index
    %c0_4 = arith.constant 0 : index
    %2 = vector.load %arg3[%c0_3, %c0_4] : memref<1x128xf32, #tpu.memory_space<vmem>>, vector<1x128xf32>
    %c0_5 = arith.constant 0 : index
    %c0_6 = arith.constant 0 : index
    %3 = vector.load %arg4[%c0_5, %c0_6] : memref<128x128xf32, #tpu.memory_space<vmem>>, vector<128x128xf32>
    %cst = arith.constant dense<0.000000e+00> : vector<8x128xf32>
    %4 = tpu.matmul %0, %1, %cst {dimension_numbers = #tpu.dot_dimension_numbers<[1], [0], [0], [1], [0, 0, 1, 1], [], []>, precision = #tpu.contract_precision<fp32>} : vector<8x128xf32>, vector<128x128xf32>, vector<8x128xf32> -> vector<8x128xf32>
    %5 = vector.broadcast %2 : vector<1x128xf32> to vector<8x128xf32>
    %6 = arith.addf %4, %5 : vector<8x128xf32>
    %cst_7 = arith.constant 5.000000e-01 : f32
    %7 = vector.broadcast %cst_7 : f32 to vector<8x128xf32>
    %8 = arith.mulf %7, %6 : vector<8x128xf32>
    %cst_8 = arith.constant 0.707106769 : f32
    %9 = vector.broadcast %cst_8 : f32 to vector<8x128xf32>
    %10 = arith.mulf %6, %9 : vector<8x128xf32>
    %11 = math.erf %10 : vector<8x128xf32>
    %cst_9 = arith.constant 1.000000e+00 : f32
    %12 = vector.broadcast %cst_9 : f32 to vector<8x128xf32>
    %13 = arith.addf %12, %11 : vector<8x128xf32>
    %14 = arith.mulf %8, %13 : vector<8x128xf32>
    %cst_10 = arith.constant dense<0.000000e+00> : vector<8x128xf32>
    %15 = tpu.matmul %14, %3, %cst_10 {dimension_numbers = #tpu.dot_dimension_numbers<[1], [0], [0], [1], [0, 0, 1, 1], [], []>, precision = #tpu.contract_precision<fp32>} : vector<8x128xf32>, vector<128x128xf32>, vector<8x128xf32> -> vector<8x128xf32>
    %c0_11 = arith.constant 0 : index
    %c0_12 = arith.constant 0 : index
    %16 = vector.load %arg5[%c0_11, %c0_12] : memref<1x128xf32, #tpu.memory_space<vmem>>, vector<1x128xf32>
    %17 = vector.broadcast %16 : vector<1x128xf32> to vector<8x128xf32>
    %18 = arith.addf %15, %17 : vector<8x128xf32>
    %c0_13 = arith.constant 0 : index
    %c0_14 = arith.constant 0 : index
    %19 = vector.load %arg6[%c0_13, %c0_14] : memref<8x128xf32, #tpu.memory_space<vmem>>, vector<8x128xf32>
    tpu.vector_store %arg6[%c0_13, %c0_14], %18 {strides = array<i32>} : memref<8x128xf32, #tpu.memory_space<vmem>>, vector<8x128xf32>,
    return
  }
  func.func @transform_0(%arg0: i32) -> (i32, i32) {
    %c0_i32 = arith.constant 0 : i32
    %c0_i32_0 = arith.constant 0 : i32
    return %arg0, %c0_i32 : i32, i32
  }
  func.func @transform_1(%arg0: i32) -> (i32, i32) {
    %c0_i32 = arith.constant 0 : i32
    %c0_i32_0 = arith.constant 0 : i32
    %c0_i32_1 = arith.constant 0 : i32
    return %c0_i32, %c0_i32_0 : i32, i32
  }
  func.func @transform_2(%arg0: i32) -> (i32, i32) {
    %c0_i32 = arith.constant 0 : i32
    %c0_i32_0 = arith.constant 0 : i32
    %c0_i32_1 = arith.constant 0 : i32
    return %c0_i32, %c0_i32_0 : i32, i32
  }
  func.func @transform_3(%arg0: i32) -> (i32, i32) {
    %c0_i32 = arith.constant 0 : i32
    %c0_i32_0 = arith.constant 0 : i32
    %c0_i32_1 = arith.constant 0 : i32
    return %c0_i32, %c0_i32_0 : i32, i32
  }
  func.func @transform_4(%arg0: i32) -> (i32, i32) {
    %c0_i32 = arith.constant 0 : i32
    %c0_i32_0 = arith.constant 0 : i32
    %c0_i32_1 = arith.constant 0 : i32
    return %c0_i32, %c0_i32_0 : i32, i32
  }
  func.func @transform_5(%arg0: i32) -> (i32, i32) {
    %c0_i32 = arith.constant 0 : i32
    %c0_i32_0 = arith.constant 0 : i32
    return %arg0, %c0_i32 : i32, i32
  }
}

</mosaic_0001>

<bundles_post_ra>
// kernel: feed_forward.1
= control target key start
LH: loop header
LB: loop body
LE: loop exit
PB: predicated region body
PF: predicated region fallthrough
CT: control target
= control target key end

     0   :  { %s2295_s18 = smov 0   ;;  %s3153_s0 = inlined_call_operand.vmem [shape: f32[16,128], index: 0, kind: input, shape index: {}]   ;;  %s3154_s1 = inlined_call_operand.vmem [shape: f32[128,128], index: 1, kind: input, shape index: {}]   ;;  %s3155_s2 = inlined_call_operand.vmem [shape: f32[1,128], index: 2, kind: input, shape index: {}]   ;;  %s3156_s3 = inlined_call_operand.vmem [shape: f32[128,128], index: 3, kind: input, shape index: {}]   ;;  %s3157_s4 = inlined_call_operand.vmem [shape: f32[1,128], index: 4, kind: input, shape index: {}]   ;;  %s3158_s5 = inlined_call_operand.vmem [shape: f32[16,128], index: 5, kind: output, shape index: {}]  }
   0x1 LB: > { %s1608_s19 = sadd.s32 4294967295, %s2261_s18   ;;  %p1612_p0 = scmp.ge.s32.totalorder %s2261_s18, 1  ;;  %s2261_s18 = sphi %s2295_s18, %s15_s18  }
   0x2   : > { %p186_p1 = scmp.lt.s32.totalorder %s2261_s18, 3 }
   0x4   : > { %p187_p2 = pnand %p1612_p0, %p186_p1 }
   0x5   : > { %p2314_p3 = scmp.lt.s32.totalorder (!%p187_p2), %s1608_s19, 1 }
   0x6   : > { %190 = sbr.rel (%p187_p2) target bundleno = 610 (0x262), region = 40 }
   0xb   : > { %v236_v0 = vld [vmem:[%s3154_s1 + $0x78] sm:$0xff]  ;;  %v235_v1 = vld [vmem:[%s3154_s1 + $0x70] sm:$0xff]  ;;  %v234_v2 = vld [vmem:[%s3154_s1 + $0x68] sm:$0xff]  ;;  %v2263_v3 = vmov 0.0   ;;  %vm2264_vm0 = vmmov 0   ;;  %s3175_s19 = smov (!%p2314_p3, %s1608_s19), 1 }
   0xc   : > { %1823 = vmatprep.subr.mxu0 %v2263_v3  ;;  %v2319_v4 = vand.u32 4294901760, %v236_v0  ;;  %v2321_v5 = vand.u32 4294901760, %v235_v1  ;;  %v2323_v6 = vand.u32 4294901760, %v234_v2  ;;  %v233_v7 = vld [vmem:[%s3154_s1 + $0x60] sm:$0xff]  ;;  %1858 = vmatprep.subr.mxu1 %v2263_v3  ;;  %v232_v8 = vld [vmem:[%s3154_s1 + $0x58] sm:$0xff]  ;;  %v231_v9 = vld [vmem:[%s3154_s1 + $0x50] sm:$0xff] }
   0xd   : > { %v2335_v10 = vand.u32 4294901760, %v233_v7  ;;  %v2337_v11 = vand.u32 4294901760, %v232_v8  ;;  %v2339_v12 = vand.u32 4294901760, %v231_v9  ;;  %v230_v13 = vld [vmem:[%s3154_s1 + $0x48] sm:$0xff]  ;;  %v229_v14 = vld [vmem:[%s3154_s1 + $0x40] sm:$0xff]  ;;  %1855 = vmatprep.mubr.msk.f32.mxu0 %vm2264_vm0, %v2263_v3  ;;  %1890 = vmatprep.mubr.msk.f32.mxu1 %vm2264_vm0, %v2263_v3  ;;  %v228_v19 = vld [vmem:[%s3154_s1 + $0x38] sm:$0xff] }
   0xe   : > { %1824 = vmatpush3.msra.mxu0 %v2319_v4  ;;  %v2353_v15 = vsub.f32 %v236_v0, %v2319_v4  ;;  %v2356_v16 = vsub.f32 %v235_v1, %v2321_v5  ;;  %v2358_v17 = vand.u32 4294901760, %v230_v13  ;;  %v2361_v18 = vsub.f32 %v234_v2, %v2323_v6  ;;  %v227_v26 = vld [vmem:[%s3154_s1 + $0x30] sm:$0xff]  ;;  %s1613_s16 = sshll.u32 %s3175_s19, 3  ;;  %v226_v36 = vld [vmem:[%s3154_s1 + $0x28] sm:$0xff]  ;;  %v225_v41 = vld [vmem:[%s3154_s1 + $0x20] sm:$0xff] }
   0xf   : > { %1825 = vmatprep.subr.mxu0 %v2263_v3  ;;  %v2374_v20 = vsub.f32 %v233_v7, %v2335_v10  ;;  %v2377_v21 = vsub.f32 %v232_v8, %v2337_v11  ;;  %v2383_v25 = vand.u32 4294901760, %v229_v14  ;;  %v2390_v28 = vand.u32 4294901760, %v228_v19  ;;  %s215_s25 = scalar_lea.vmem %s3153_s0, %s1613_s16  ;;  %v224_v49 = vld [vmem:[%s3154_s1 + $0x18] sm:$0xff]  ;;  %v223_v54 = vld [vmem:[%s3154_s1 + $0x10] sm:$0xff]  ;;  %v222_v60 = vld [vmem:[%s3154_s1 + $0x8] sm:$0xff]  ;;  %s219_s28 = scalar_lea.vmem %s3158_s5, %s1613_s16 }
  0x10   : > { %1826 = vmatpush3.msra.mxu0 %v2321_v5  ;;  %v354_v22 = vand.u32 4294901760, %v2353_v15  ;;  %v361_v23 = vand.u32 4294901760, %v2356_v16  ;;  %v368_v24 = vand.u32 4294901760, %v2361_v18  ;;  %v2394_v30 = vsub.f32 %v231_v9, %v2339_v12  ;;  %v220_v50 = vld [vmem:[%s215_s25] sm:$0xff] }
  0x11   : > { %1827 = vmatprep.subr.mxu0 %v2263_v3  ;;  %v375_v27 = vand.u32 4294901760, %v2374_v20  ;;  %v382_v29 = vand.u32 4294901760, %v2377_v21  ;;  %v2408_v34 = vsub.f32 %v230_v13, %v2358_v17  ;;  %v2411_v35 = vand.u32 4294901760, %v227_v26  ;;  %v221_v7 = vld [vmem:[%s3154_s1] sm:$0xff] }
  0x12   : > { %1828 = vmatpush3.msra.mxu0 %v2323_v6  ;;  %v355_v31 = vsub.f32 %v2353_v15, %v354_v22  ;;  %v362_v32 = vsub.f32 %v2356_v16, %v361_v23  ;;  %v369_v33 = vsub.f32 %v2361_v18, %v368_v24  ;;  %v389_v40 = vand.u32 4294901760, %v2394_v30 }
  0x13   : > { %1829 = vmatprep.subr.mxu0 %v2263_v3  ;;  %v376_v39 = vsub.f32 %v2374_v20, %v375_v27  ;;  %v383_v42 = vsub.f32 %v2377_v21, %v382_v29  ;;  %v2434_v43 = vsub.f32 %v229_v14, %v2383_v25  ;;  %v2437_v45 = vand.u32 4294901760, %v226_v36 }
  0x14   : > { %1830 = vmatpush3.msra.mxu0 %v2335_v10  ;;  %v356_v37 = vand.u32 4294901760, %v355_v31  ;;  %v363_v38 = vand.u32 4294901760, %v362_v32  ;;  %v370_v44 = vand.u32 4294901760, %v369_v33  ;;  %v396_v46 = vand.u32 4294901760, %v2408_v34 }
  0x15   : > { %1831 = vmatprep.subr.mxu0 %v2263_v3  ;;  %v2441_v47 = vsub.f32 %v228_v19, %v2390_v28  ;;  %v2445_v48 = vand.u32 4294901760, %v225_v41  ;;  %v377_v51 = vand.u32 4294901760, %v376_v39  ;;  %v390_v52 = vsub.f32 %v2394_v30, %v389_v40 }
  0x16   : > { %1832 = vmatpush3.msra.mxu0 %v2337_v11  ;;  %1859 = vmatpush3.msra.mxu1 %v356_v37  ;;  %v403_v53 = vand.u32 4294901760, %v2434_v43  ;;  %v2459_v55 = vsub.f32 %v227_v26, %v2411_v35  ;;  %v384_v56 = vand.u32 4294901760, %v383_v42  ;;  %v397_v58 = vsub.f32 %v2408_v34, %v396_v46 }
  0x17   : > { %1833 = vmatprep.subr.mxu0 %v2263_v3  ;;  %1860 = vmatprep.subr.mxu1 %v2263_v3  ;;  %v410_v57 = vand.u32 4294901760, %v2441_v47  ;;  %v2468_v59 = vand.u32 4294901760, %v224_v49  ;;  %v2474_v61 = vsub.f32 %v226_v36, %v2437_v45  ;;  %v2476_v62 = vand.u32 4294901760, %v220_v50 }
  0x18   : > { %1834 = vmatpush3.msra.mxu0 %v2339_v12  ;;  %1861 = vmatpush3.msra.mxu1 %v363_v38  ;;  %v2480_v63 = vand.u32 4294901760, %v223_v54  ;;  %v391_v0 = vand.u32 4294901760, %v390_v52  ;;  %v404_v1 = vsub.f32 %v2434_v43, %v403_v53  ;;  %v417_v2 = vand.u32 4294901760, %v2459_v55 }
  0x19   : > { %1835 = vmatprep.subr.mxu0 %v2263_v3  ;;  %1862 = vmatprep.subr.mxu1 %v2263_v3  ;;  %v2491_v8 = vsub.f32 %v225_v41, %v2445_v48  ;;  %v411_v9 = vsub.f32 %v2441_v47, %v410_v57  ;;  %v2498_v13 = vand.u32 4294901760, %v222_v60  ;;  %v398_v14 = vand.u32 4294901760, %v397_v58 }
  0x1a   : > { %1836 = vmatpush3.msra.mxu0 %v2358_v17  ;;  %1863 = vmatpush3.msra.mxu1 %v370_v44  ;;  %v424_v19 = vand.u32 4294901760, %v2474_v61  ;;  %v2503_v26 = vsub.f32 %v220_v50, %v2476_v62  ;;  %v2506_v31 = vsub.f32 %v224_v49, %v2468_v59  ;;  %v2510_v32 = vand.u32 4294901760, %v221_v7 }
  0x1b   : > { %1837 = vmatprep.subr.mxu0 %v2263_v3  ;;  %1864 = vmatprep.subr.mxu1 %v2263_v3  ;;  %v405_v33 = vand.u32 4294901760, %v404_v1  ;;  %v418_v36 = vsub.f32 %v2459_v55, %v417_v2  ;;  %v431_v37 = vand.u32 4294901760, %v2491_v8  ;;  %v2518_v38 = vsub.f32 %v223_v54, %v2480_v63 }
  0x1c   : > { %1838 = vmatpush3.msra.mxu0 %v2383_v25  ;;  %1865 = vmatpush3.msra.mxu1 %v377_v51  ;;  %v412_v39 = vand.u32 4294901760, %v411_v9  ;;  %v425_v41 = vsub.f32 %v2474_v61, %v424_v19  ;;  %v343_v42 = vand.u32 4294901760, %v2503_v26  ;;  %v438_v44 = vand.u32 4294901760, %v2506_v31 }
  0x1d   : > { %1839 = vmatprep.subr.mxu0 %v2263_v3  ;;  %1866 = vmatprep.subr.mxu1 %v2263_v3  ;;  %v2529_v49 = vsub.f32 %v222_v60, %v2498_v13  ;;  %v419_v50 = vand.u32 4294901760, %v418_v36  ;;  %v432_v51 = vsub.f32 %v2491_v8, %v431_v37  ;;  %v445_v52 = vand.u32 4294901760, %v2518_v38 }
  0x1e   : > { %1840 = vmatpush3.msra.mxu0 %v2390_v28  ;;  %1867 = vmatpush3.msra.mxu1 %v384_v56  ;;  %v2539_v54 = vsub.f32 %v221_v7, %v2510_v32  ;;  %v426_v56 = vand.u32 4294901760, %v425_v41  ;;  %v344_v58 = vsub.f32 %v2503_v26, %v343_v42  ;;  %v439_v60 = vsub.f32 %v2506_v31, %v438_v44 }
  0x1f   : > { %1841 = vmatprep.subr.mxu0 %v2263_v3  ;;  %1868 = vmatprep.subr.mxu1 %v2263_v3  ;;  %v433_v1 = vand.u32 4294901760, %v432_v51  ;;  %v446_v7 = vsub.f32 %v2518_v38, %v445_v52 }
  0x20   : > { %1842 = vmatpush3.msra.mxu0 %v2411_v35  ;;  %1869 = vmatpush3.msra.mxu1 %v391_v0  ;;  %v452_v0 = vand.u32 4294901760, %v2529_v49  ;;  %v459_v9 = vand.u32 4294901760, %v2539_v54 }
  0x21   : > { %1843 = vmatprep.subr.mxu0 %v2263_v3  ;;  %1870 = vmatprep.subr.mxu1 %v2263_v3 }
  0x22   : > { %1844 = vmatpush3.msra.mxu0 %v2437_v45  ;;  %1871 = vmatpush3.msra.mxu1 %v398_v14  ;;  %v345_v14 = vand.u32 4294901760, %v344_v58  ;;  %v453_v36 = vsub.f32 %v2529_v49, %v452_v0  ;;  %v460_v41 = vsub.f32 %v2539_v54, %v459_v9  ;;  %v243_v58 = vld [vmem:[%s3156_s3 + $0x28] sm:$0xff] }
  0x23   : > { %1845 = vmatprep.subr.mxu0 %v2263_v3  ;;  %1872 = vmatprep.subr.mxu1 %v2263_v3 }
  0x24   : > { %1846 = vmatpush3.msra.mxu0 %v2445_v48  ;;  %1873 = vmatpush3.msra.mxu1 %v405_v33  ;;  %v440_v33 = vand.u32 4294901760, %v439_v60  ;;  %v461_v51 = vand.u32 4294901760, %v460_v41 }
  0x25   : > { %1847 = vmatprep.subr.mxu0 %v2263_v3  ;;  %1874 = vmatprep.subr.mxu1 %v2263_v3 }
  0x26   : > { %1848 = vmatpush3.msra.mxu0 %v2468_v59  ;;  %1875 = vmatpush3.msra.mxu1 %v412_v39  ;;  %v447_v39 = vand.u32 4294901760, %v446_v7  ;;  %v2873_v7 = vand.u32 4294901760, %v243_v58 }
  0x27   : > { %1849 = vmatprep.subr.mxu0 %v2263_v3  ;;  %1876 = vmatprep.subr.mxu1 %v2263_v3 }
  0x28   : > { %1850 = vmatpush3.msra.mxu0 %v2480_v63  ;;  %1877 = vmatpush3.msra.mxu1 %v419_v50  ;;  %v454_v50 = vand.u32 4294901760, %v453_v36 }
  0x29   : > { %1851 = vmatprep.subr.mxu0 %v2263_v3  ;;  %1878 = vmatprep.subr.mxu1 %v2263_v3 }
  0x2a   : > { %1852 = vmatpush3.msra.mxu0 %v2498_v13  ;;  %1879 = vmatpush3.msra.mxu1 %v426_v56 }
  0x2b   : > { %1853 = vmatprep.subr.mxu0 %v2263_v3  ;;  %1880 = vmatprep.subr.mxu1 %v2263_v3 }
  0x2c   : > { %1854 = vmatpush3.msra.mxu0 %v2510_v32  ;;  %1881 = vmatpush3.msra.mxu1 %v433_v1 }
  0x2d   : > { %1882 = vmatprep.subr.mxu1 %v2263_v3  ;;  %1893 = vmatprep.subr.mxu0 %v2263_v3 }
  0x2e   : > { %1856 = vmatmul.mubr.f32.vlgmr.msra.gmra.mxu0 %v345_v14  ;;  %1883 = vmatpush3.msra.mxu1 %v440_v33  ;;  %v242_v14 = vld [vmem:[%s3156_s3 + $0x20] sm:$0xff] }
  0x2f   : > { %1894 = vmatpush3.msra.mxu0 %v2353_v15  ;;  %1884 = vmatprep.subr.mxu1 %v2263_v3  ;;  %v2890_v41 = vand.u32 4294901760, %v242_v14 }
  0x30   : > { %1895 = vmatprep.subr.mxu0 %v2263_v3  ;;  %1885 = vmatpush3.msra.mxu1 %v447_v39  ;;  %v2888_v39 = vsub.f32 %v243_v58, %v2873_v7 }
  0x31   : > { %1896 = vmatpush3.msra.mxu0 %v2356_v16  ;;  %1886 = vmatprep.subr.mxu1 %v2263_v3 }
  0x32   : > { %1897 = vmatprep.subr.mxu0 %v2263_v3  ;;  %1887 = vmatpush3.msra.mxu1 %v454_v50 }
  0x33   : > { %1898 = vmatpush3.msra.mxu0 %v2361_v18  ;;  %1888 = vmatprep.subr.mxu1 %v2263_v3  ;;  %v250_v18 = vld [vmem:[%s3156_s3 + $0x60] sm:$0xff] }
  0x34   : > { %1899 = vmatprep.subr.mxu0 %v2263_v3  ;;  %1889 = vmatpush3.msra.mxu1 %v461_v51  ;;  %v241_v51 = vld [vmem:[%s3156_s3 + $0x18] sm:$0xff] }
  0x35   : > { %1900 = vmatpush3.msra.mxu0 %v2374_v20  ;;  %1891 = vmatmul.mubr.f32.vlgmr.msra.gmra.mxu1 %v2476_v62 }
  0x36   : > { %1901 = vmatprep.subr.mxu0 %v2263_v3  ;;  %1928 = vmatprep.subr.mxu1 %v2263_v3 }
  0x37   : > { %1902 = vmatpush3.msra.mxu0 %v2377_v21  ;;  %1929 = vmatpush3.msra.mxu1 %v2319_v4 }
  0x38   : > { %1903 = vmatprep.subr.mxu0 %v2263_v3  ;;  %1930 = vmatprep.subr.mxu1 %v2263_v3 }
  0x39   : > { %1904 = vmatpush3.msra.mxu0 %v2394_v30  ;;  %1931 = vmatpush3.msra.mxu1 %v2321_v5 }
  0x3a   : > { %1905 = vmatprep.subr.mxu0 %v2263_v3  ;;  %1932 = vmatprep.subr.mxu1 %v2263_v3 }
  0x3b   : > { %1906 = vmatpush3.msra.mxu0 %v2408_v34  ;;  %1933 = vmatpush3.msra.mxu1 %v2323_v6  ;;  %v248_v34 = vld [vmem:[%s3156_s3 + $0x50] sm:$0xff] }
  0x3c   : > { %1907 = vmatprep.subr.mxu0 %v2263_v3  ;;  %1934 = vmatprep.subr.mxu1 %v2263_v3 }
  0x3d   : > { %1908 = vmatpush3.msra.mxu0 %v2434_v43  ;;  %1935 = vmatpush3.msra.mxu1 %v2335_v10 }
  0x3e   : > { %1909 = vmatprep.subr.mxu0 %v2263_v3  ;;  %1936 = vmatprep.subr.mxu1 %v2263_v3 }
  0x3f   : > { %1910 = vmatpush3.msra.mxu0 %v2441_v47  ;;  %1937 = vmatpush3.msra.mxu1 %v2337_v11  ;;  %v247_v47 = vld [vmem:[%s3156_s3 + $0x48] sm:$0xff] }
  0x40   : > { %1911 = vmatprep.subr.mxu0 %v2263_v3  ;;  %1938 = vmatprep.subr.mxu1 %v2263_v3 }
  0x41   : > { %1912 = vmatpush3.msra.mxu0 %v2459_v55  ;;  %1939 = vmatpush3.msra.mxu1 %v2339_v12 }
  0x42   : > { %1913 = vmatprep.subr.mxu0 %v2263_v3  ;;  %1940 = vmatprep.subr.mxu1 %v2263_v3 }
  0x43   : > { %1914 = vmatpush3.msra.mxu0 %v2474_v61  ;;  %1941 = vmatpush3.msra.mxu1 %v2358_v17  ;;  %v246_v61 = vld [vmem:[%s3156_s3 + $0x40] sm:$0xff] }
  0x44   : > { %1915 = vmatprep.subr.mxu0 %v2263_v3  ;;  %1942 = vmatprep.subr.mxu1 %v2263_v3 }
  0x45   : > { %1916 = vmatpush3.msra.mxu0 %v2491_v8  ;;  %1943 = vmatpush3.msra.mxu1 %v2383_v25  ;;  %v2828_v8 = vand.u32 4294901760, %v246_v61 }
  0x46   : > { %1917 = vmatprep.subr.mxu0 %v2263_v3  ;;  %1944 = vmatprep.subr.mxu1 %v2263_v3 }
  0x47   : > { %1918 = vmatpush3.msra.mxu0 %v2506_v31  ;;  %1945 = vmatpush3.msra.mxu1 %v2390_v28 }
  0x48   : > { %1919 = vmatprep.subr.mxu0 %v2263_v3  ;;  %1946 = vmatprep.subr.mxu1 %v2263_v3 }
  0x49   : > { %1920 = vmatpush3.msra.mxu0 %v2518_v38  ;;  %1947 = vmatpush3.msra.mxu1 %v2411_v35 }
  0x4a   : > { %1921 = vmatprep.subr.mxu0 %v2263_v3  ;;  %1948 = vmatprep.subr.mxu1 %v2263_v3 }
  0x4b   : > { %1922 = vmatpush3.msra.mxu0 %v2529_v49  ;;  %1949 = vmatpush3.msra.mxu1 %v2437_v45 }
  0x4c   : > { %1923 = vmatprep.subr.mxu0 %v2263_v3  ;;  %1950 = vmatprep.subr.mxu1 %v2263_v3 }
  0x4d   : > { %1924 = vmatpush3.msra.mxu0 %v2539_v54  ;;  %1925 = vmatprep.mubr.msk.f32.mxu0 %vm2264_vm0, %v2263_v3 }
  0x4e   : > { %1951 = vmatpush3.msra.mxu1 %v2445_v48  ;;  %1926 = vmatmul.mubr.f32.vlgmr.msra.gmra.mxu0 %v2503_v26 }
  0x4f   : > { %1952 = vmatprep.subr.mxu1 %v2263_v3  ;;  %1963 = vmatprep.subr.mxu0 %v2263_v3 }
  0x50   : > { %1953 = vmatpush3.msra.mxu1 %v2468_v59  ;;  %1964 = vmatpush3.msra.mxu0 %v354_v22 }
  0x51   : > { %1954 = vmatprep.subr.mxu1 %v2263_v3  ;;  %1965 = vmatprep.subr.mxu0 %v2263_v3 }
  0x52   : > { %1955 = vmatpush3.msra.mxu1 %v2480_v63  ;;  %1966 = vmatpush3.msra.mxu0 %v361_v23  ;;  %v2774_v23 = vand.u32 4294901760, %v250_v18 }
  0x53   : > { %1956 = vmatprep.subr.mxu1 %v2263_v3  ;;  %1967 = vmatprep.subr.mxu0 %v2263_v3 }
  0x54   : > { %1957 = vmatpush3.msra.mxu1 %v2498_v13  ;;  %1968 = vmatpush3.msra.mxu0 %v368_v24  ;;  %v249_v24 = vld [vmem:[%s3156_s3 + $0x58] sm:$0xff] }
  0x55   : > { %1958 = vmatprep.subr.mxu1 %v2263_v3  ;;  %1969 = vmatprep.subr.mxu0 %v2263_v3  ;;  %v2789_v30 = vand.u32 4294901760, %v249_v24 }
  0x56   : > { %1959 = vmatpush3.msra.mxu1 %v2510_v32  ;;  %1960 = vmatprep.mubr.msk.f32.mxu1 %vm2264_vm0, %v2263_v3 }
  0x57   : > { %1970 = vmatpush3.msra.mxu0 %v375_v27  ;;  %1961 = vmatmul.mubr.f32.vlgmr.msra.gmra.mxu1 %v343_v42  ;;  %v244_v42 = vld [vmem:[%s3156_s3 + $0x30] sm:$0xff] }
  0x58   : > { %1971 = vmatprep.subr.mxu0 %v2263_v3  ;;  %1998 = vmatprep.subr.mxu1 %v2263_v3  ;;  %v2862_v56 = vand.u32 4294901760, %v244_v42 }
  0x59   : > { %1972 = vmatpush3.msra.mxu0 %v382_v29  ;;  %1999 = vmatpush3.msra.mxu1 %v2319_v4  ;;  %v253_v4 = vld [vmem:[%s3156_s3 + $0x78] sm:$0xff]  ;;  %v2786_v29 = vsub.f32 %v250_v18, %v2774_v23  ;;  %v2903_v18 = vand.u32 4294901760, %v241_v51 }
  0x5a   : > { %1973 = vmatprep.subr.mxu0 %v2263_v3  ;;  %2000 = vmatprep.subr.mxu1 %v2263_v3 }
  0x5b   : > { %1974 = vmatpush3.msra.mxu0 %v389_v40  ;;  %2001 = vmatpush3.msra.mxu1 %v2321_v5  ;;  %v2741_v5 = vand.u32 4294901760, %v253_v4  ;;  %v1028_v43 = vand.u32 4294901760, %v2786_v29 }
  0x5c   : > { %1975 = vmatprep.subr.mxu0 %v2263_v3  ;;  %2002 = vmatprep.subr.mxu1 %v2263_v3 }
  0x5d   : > { %1976 = vmatpush3.msra.mxu0 %v396_v46  ;;  %2003 = vmatpush3.msra.mxu1 %v2323_v6  ;;  %v252_v6 = vld [vmem:[%s3156_s3 + $0x70] sm:$0xff]  ;;  %v2803_v46 = vsub.f32 %v249_v24, %v2789_v30 }
  0x5e   : > { %1977 = vmatprep.subr.mxu0 %v2263_v3  ;;  %2004 = vmatprep.subr.mxu1 %v2263_v3  ;;  %v240_v24 = vld [vmem:[%s3156_s3 + $0x10] sm:$0xff] }
  0x5f   : > { %1978 = vmatpush3.msra.mxu0 %v403_v53  ;;  %2005 = vmatpush3.msra.mxu1 %v2335_v10  ;;  %v2747_v10 = vsub.f32 %v253_v4, %v2741_v5  ;;  %v1029_v53 = vsub.f32 %v2786_v29, %v1028_v43 }
  0x60   : > { %1979 = vmatprep.subr.mxu0 %v2263_v3  ;;  %2006 = vmatprep.subr.mxu1 %v2263_v3 }
  0x61   : > { %1980 = vmatpush3.msra.mxu0 %v410_v57  ;;  %2007 = vmatpush3.msra.mxu1 %v2337_v11  ;;  %v2749_v11 = vand.u32 4294901760, %v252_v6  ;;  %v1007_v15 = vand.u32 4294901760, %v2747_v10  ;;  %v2815_v57 = vand.u32 4294901760, %v247_v47 }
  0x62   : > { %1981 = vmatprep.subr.mxu0 %v2263_v3  ;;  %2008 = vmatprep.subr.mxu1 %v2263_v3 }
  0x63   : > { %1982 = vmatpush3.msra.mxu0 %v417_v2  ;;  %2009 = vmatpush3.msra.mxu1 %v2339_v12  ;;  %v251_v12 = vld [vmem:[%s3156_s3 + $0x68] sm:$0xff]  ;;  %v2758_v16 = vsub.f32 %v252_v6, %v2749_v11  ;;  %v1008_v20 = vsub.f32 %v2747_v10, %v1007_v15  ;;  %v2826_v2 = vsub.f32 %v247_v47, %v2815_v57  ;;  %v3164_v6 = vand.u32 4294901760, %v2888_v39 }
  0x64   : > { %1983 = vmatprep.subr.mxu0 %v2263_v3  ;;  %2010 = vmatprep.subr.mxu1 %v2263_v3  ;;  %v239_v47 = vld [vmem:[%s3156_s3 + $0x8] sm:$0xff] }
  0x65   : > { %1984 = vmatpush3.msra.mxu0 %v424_v19  ;;  %2011 = vmatpush3.msra.mxu1 %v2358_v17  ;;  %v2760_v17 = vand.u32 4294901760, %v251_v12  ;;  %v1014_v21 = vand.u32 4294901760, %v2758_v16  ;;  %v245_v19 = vld [vmem:[%s3156_s3 + $0x38] sm:$0xff]  ;;  %v1049_v31 = vand.u32 4294901760, %v2826_v2 }
  0x66   : > { %1985 = vmatprep.subr.mxu0 %v2263_v3  ;;  %2012 = vmatprep.subr.mxu1 %v2263_v3 }
  0x67   : > { %1986 = vmatpush3.msra.mxu0 %v431_v37  ;;  %2013 = vmatpush3.msra.mxu1 %v2383_v25  ;;  %v2772_v22 = vsub.f32 %v251_v12, %v2760_v17  ;;  %v1009_v25 = vand.u32 4294901760, %v1008_v20  ;;  %v1015_v27 = vsub.f32 %v2758_v16, %v1014_v21  ;;  %v2846_v37 = vand.u32 4294901760, %v245_v19 }
  0x68   : > { %1987 = vmatprep.subr.mxu0 %v2263_v3  ;;  %2014 = vmatprep.subr.mxu1 %v2263_v3  ;;  %v1050_v49 = vsub.f32 %v2826_v2, %v1049_v31  ;;  %v2901_v12 = vsub.f32 %v242_v14, %v2890_v41 }
  0x69   : > { %1988 = vmatpush3.msra.mxu0 %v438_v44  ;;  %2015 = vmatpush3.msra.mxu1 %v2390_v28  ;;  %v1021_v28 = vand.u32 4294901760, %v2772_v22  ;;  %v2859_v54 = vsub.f32 %v245_v19, %v2846_v37  ;;  %v238_v19 = vld [vmem:[%s3156_s3] sm:$0xff] }
  0x6a   : > { %1989 = vmatprep.subr.mxu0 %v2263_v3  ;;  %2016 = vmatprep.subr.mxu1 %v2263_v3  ;;  %v1051_v60 = vand.u32 4294901760, %v1050_v49 }
  0x6b   : > { %1990 = vmatpush3.msra.mxu0 %v445_v52  ;;  %2017 = vmatpush3.msra.mxu1 %v2411_v35  ;;  %v1016_v35 = vand.u32 4294901760, %v1015_v27  ;;  %v1022_v40 = vsub.f32 %v2772_v22, %v1021_v28  ;;  %v1063_v1 = vand.u32 4294901760, %v2859_v54  ;;  %v3163_v27 = vand.u32 4294901760, %v2901_v12 }
  0x6c   : > { %1991 = vmatprep.subr.mxu0 %v2263_v3  ;;  %2018 = vmatprep.subr.mxu1 %v2263_v3 }
  0x6d   : > { %1992 = vmatpush3.msra.mxu0 %v452_v0  ;;  %2019 = vmatpush3.msra.mxu1 %v2437_v45  ;;  %v2799_v45 = vand.u32 4294901760, %v248_v34  ;;  %v1064_v36 = vsub.f32 %v2859_v54, %v1063_v1 }
  0x6e   : > { %1993 = vmatprep.subr.mxu0 %v2263_v3  ;;  %2020 = vmatprep.subr.mxu1 %v2263_v3 }
  0x6f   : > { %1994 = vmatpush3.msra.mxu0 %v459_v9  ;;  %1995 = vmatprep.mubr.msk.f32.mxu0 %vm2264_vm0, %v2263_v3  ;;  %v2813_v55 = vsub.f32 %v248_v34, %v2799_v45  ;;  %v2877_v9 = vsub.f32 %v244_v42, %v2862_v56  ;;  %v1065_v4 = vand.u32 4294901760, %v1064_v36  ;;  %v2919_v34 = vsub.f32 %v241_v51, %v2903_v18 }
  0x70   : > { %2021 = vmatpush3.msra.mxu1 %v2445_v48  ;;  %1996 = vmatmul.mubr.f32.vlgmr.msra.gmra.mxu0 %v2476_v62  ;;  %v1023_v48 = vand.u32 4294901760, %v1022_v40 }
  0x71   : > { %2022 = vmatprep.subr.mxu1 %v2263_v3  ;;  %2030 = vmatprep.mubr.msk.f32.mxu1 %vm2264_vm0, %v2263_v3  ;;  %v3165_v50 = vand.u32 4294901760, %v2877_v9 }
  0x72   : > { %2023 = vmatpush3.msra.mxu1 %v2468_v59  ;;  %2033 = vmatprep.subr.mxu0 %v2263_v3  ;;  %v1035_v59 = vand.u32 4294901760, %v2803_v46 }
  0x73   : > { %2024 = vmatprep.subr.mxu1 %v2263_v3  ;;  %2065 = vmatprep.mubr.msk.f32.mxu0 %vm2264_vm0, %v2263_v3  ;;  %v1071_v20 = vsub.f32 %v2877_v9, %v3165_v50 }
  0x74   : > { %2025 = vmatpush3.msra.mxu1 %v2480_v63  ;;  %2034 = vmatpush3.msra.mxu0 %v2741_v5  ;;  %v1042_v63 = vand.u32 4294901760, %v2813_v55 }
  0x75   : > { %2026 = vmatprep.subr.mxu1 %v2263_v3  ;;  %2035 = vmatprep.subr.mxu0 %v2263_v3  ;;  %v1072_v40 = vand.u32 4294901760, %v1071_v20 }
  0x76   : > { %2027 = vmatpush3.msra.mxu1 %v2498_v13  ;;  %2036 = vmatpush3.msra.mxu0 %v2749_v11  ;;  %v1036_v13 = vsub.f32 %v2803_v46, %v1035_v59  ;;  %v1043_v26 = vsub.f32 %v2813_v55, %v1042_v63 }
  0x77   : > { %2028 = vmatprep.subr.mxu1 %v2263_v3  ;;  %2037 = vmatprep.subr.mxu0 %v2263_v3 }
  0x78   : > { %2029 = vmatpush3.msra.mxu1 %v2510_v32  ;;  %2038 = vmatpush3.msra.mxu0 %v2760_v17  ;;  %v2844_v32 = vsub.f32 %v246_v61, %v2828_v8  ;;  %v1037_v38 = vand.u32 4294901760, %v1036_v13  ;;  %v1044_v44 = vand.u32 4294901760, %v1043_v26  ;;  %v3162_v61 = vand.u32 4294901760, %v2919_v34 }
  0x79   : > { %2031 = vmatmul.mubr.f32.vlgmr.msra.gmra.mxu1 %v2476_v62  ;;  %2068 = vmatprep.subr.mxu1 %v2263_v3  ;;  %v1030_v62 = vand.u32 4294901760, %v1029_v53  ;;  %v1085_v53 = vsub.f32 %v2901_v12, %v3163_v27  ;;  %v2937_v13 = vand.u32 4294901760, %v239_v47 }
  0x7a   : > { %2100 = vmatprep.mubr.msk.f32.mxu1 %vm2264_vm0, %v2263_v3  ;;  %2039 = vmatprep.subr.mxu0 %v2263_v3  ;;  %v1056_v52 = vand.u32 4294901760, %v2844_v32 }
  0x7b   : > { %2040 = vmatpush3.msra.mxu0 %v2774_v23  ;;  %2069 = vmatpush3.msra.mxu1 %v1009_v25  ;;  %v1078_v25 = vsub.f32 %v2888_v39, %v3164_v6  ;;  %v1086_v26 = vand.u32 4294901760, %v1085_v53  ;;  %v2952_v49 = vsub.f32 %v239_v47, %v2937_v13 }
  0x7c   : > { %2041 = vmatprep.subr.mxu0 %v2263_v3  ;;  %2070 = vmatprep.subr.mxu1 %v2263_v3  ;;  %v1057_v0 = vsub.f32 %v2844_v32, %v1056_v52 }
  0x7d   : > { %2042 = vmatpush3.msra.mxu0 %v2789_v30  ;;  %2071 = vmatpush3.msra.mxu1 %v1016_v35  ;;  %v2921_v35 = vand.u32 4294901760, %v240_v24  ;;  %v3160_v14 = vand.u32 4294901760, %v2952_v49 }
  0x7e   : > { %2043 = vmatprep.subr.mxu0 %v2263_v3  ;;  %2072 = vmatprep.subr.mxu1 %v2263_v3  ;;  %v1058_v33 = vand.u32 4294901760, %v1057_v0 }
  0x7f   : > { %2044 = vmatpush3.msra.mxu0 %v2799_v45  ;;  %2073 = vmatpush3.msra.mxu1 %v1023_v48  ;;  %v1079_v48 = vand.u32 4294901760, %v1078_v25  ;;  %v1106_v51 = vsub.f32 %v2952_v49, %v3160_v14 }
  0x80   : > { %2045 = vmatprep.subr.mxu0 %v2263_v3  ;;  %2074 = vmatprep.subr.mxu1 %v2263_v3 }
  0x81   : > { %2046 = vmatpush3.msra.mxu0 %v2815_v57  ;;  %2075 = vmatpush3.msra.mxu1 %v1030_v62  ;;  %v2934_v62 = vsub.f32 %v240_v24, %v2921_v35  ;;  %v1107_v20 = vand.u32 4294901760, %v1106_v51 }
  0x82   : > { %2047 = vmatprep.subr.mxu0 %v2263_v3  ;;  %2076 = vmatprep.subr.mxu1 %v2263_v3 }
  0x83   : > { %2048 = vmatpush3.msra.mxu0 %v2828_v8  ;;  %2077 = vmatpush3.msra.mxu1 %v1037_v38  ;;  %v1092_v38 = vsub.f32 %v2919_v34, %v3162_v61  ;;  %v3161_v42 = vand.u32 4294901760, %v2934_v62 }
  0x84   : > { %2049 = vmatprep.subr.mxu0 %v2263_v3  ;;  %2078 = vmatprep.subr.mxu1 %v2263_v3 }
  0x85   : > { %2050 = vmatpush3.msra.mxu0 %v2846_v37  ;;  %2079 = vmatpush3.msra.mxu1 %v1044_v44  ;;  %v2948_v44 = vand.u32 4294901760, %v238_v19  ;;  %v1093_v58 = vand.u32 4294901760, %v1092_v38 }
  0x86   : > { %2051 = vmatprep.subr.mxu0 %v2263_v3  ;;  %2080 = vmatprep.subr.mxu1 %v2263_v3 }
  0x87   : > { %2052 = vmatpush3.msra.mxu0 %v2862_v56  ;;  %2081 = vmatpush3.msra.mxu1 %v1051_v60  ;;  %v1099_v60 = vsub.f32 %v2934_v62, %v3161_v42  ;;  %v2960_v0 = vsub.f32 %v238_v19, %v2948_v44 }
  0x88   : > { %2053 = vmatprep.subr.mxu0 %v2263_v3  ;;  %2082 = vmatprep.subr.mxu1 %v2263_v3 }
  0x89   : > { %2054 = vmatpush3.msra.mxu0 %v2873_v7  ;;  %2083 = vmatpush3.msra.mxu1 %v1058_v33  ;;  %v1100_v33 = vand.u32 4294901760, %v1099_v60  ;;  %v3159_v36 = vand.u32 4294901760, %v2960_v0 }
  0x8a   : > { %2055 = vmatprep.subr.mxu0 %v2263_v3  ;;  %2084 = vmatprep.subr.mxu1 %v2263_v3 }
  0x8b   : > { %2056 = vmatpush3.msra.mxu0 %v2890_v41  ;;  %2085 = vmatpush3.msra.mxu1 %v1065_v4  ;;  %v1113_v4 = vsub.f32 %v2960_v0, %v3159_v36 }
  0x8c   : > { %2057 = vmatprep.subr.mxu0 %v2263_v3  ;;  %2086 = vmatprep.subr.mxu1 %v2263_v3 }
  0x8d   : > { %2058 = vmatpush3.msra.mxu0 %v2903_v18  ;;  %2087 = vmatpush3.msra.mxu1 %v1072_v40  ;;  %v1114_v24 = vand.u32 4294901760, %v1113_v4 }
  0x8e   : > { %2059 = vmatprep.subr.mxu0 %v2263_v3  ;;  %2088 = vmatprep.subr.mxu1 %v2263_v3 }
  0x8f   : > { %2060 = vmatpush3.msra.mxu0 %v2921_v35  ;;  %2089 = vmatpush3.msra.mxu1 %v1079_v48 }
  0x90   : > { %2061 = vmatprep.subr.mxu0 %v2263_v3  ;;  %2090 = vmatprep.subr.mxu1 %v2263_v3 }
  0x91   : > { %2062 = vmatpush3.msra.mxu0 %v2937_v13  ;;  %2091 = vmatpush3.msra.mxu1 %v1086_v26 }
  0x92   : > { %2063 = vmatprep.subr.mxu0 %v2263_v3  ;;  %2092 = vmatprep.subr.mxu1 %v2263_v3 }
  0x93   : > { %2064 = vmatpush3.msra.mxu0 %v2948_v44  ;;  %2093 = vmatpush3.msra.mxu1 %v1093_v58  ;;  %v1615_v58 = vld [vmem:[%s3155_s2] ss:$0 sm:$0xff] }
  0x94   : > { %2103 = vmatprep.subr.mxu0 %v2263_v3  ;;  %2094 = vmatprep.subr.mxu1 %v2263_v3 }
  0x95   : > { %2095 = vmatpush3.msra.mxu1 %v1100_v33 }
  0x96   : > { %2096 = vmatprep.subr.mxu1 %v2263_v3 }
  0x97   : > { %2097 = vmatpush3.msra.mxu1 %v1107_v20 }
  0x98   : > { %2098 = vmatprep.subr.mxu1 %v2263_v3 }
  0x99   : > { %2099 = vmatpush3.msra.mxu1 %v1114_v24 }
  0x9a   : > { %2138 = vmatprep.subr.mxu1 %v2263_v3 }
  0xee   : > { %v347_v25 = vpop.f32.mrf.mxu0 }
  0xef   : > { %v348_v60 = vadd.f32 %v1615_v58, %v347_v25 }
  0xf0   : > { %v1857_v40 = vpop.f32.mrf.mxu0 }
  0xf5   : > { %v498_v47 = vpop.f32.mrf.mxu1 }
  0xf6   : > { %v499_v51 = vadd.f32 %v498_v47, %v348_v60 }
  0xf7   : > { %v1892_v48 = vpop.f32.mrf.mxu1 }
 0x10e   : > { %v602_v53 = vpop.f32.mrf.mxu0 }
 0x10f   : > { %v603_v20 = vadd.f32 %v602_v53, %v499_v51 }
 0x110   : > { %v1927_v19 = vpop.f32.mrf.mxu0 }
 0x117   : > { %v691_v26 = vpop.f32.mrf.mxu1 }
 0x118   : > { %v692_v24 = vadd.f32 %v691_v26, %v603_v20 }
 0x119   : > { %v1962_v38 = vpop.f32.mrf.mxu1 }
 0x130   : > { %v810_v33 = vpop.f32.mrf.mxu0 }
 0x131   : > { %v811_v36 = vadd.f32 %v810_v33, %v692_v24 }
 0x132   : > { %v1997_v4 = vpop.f32.mrf.mxu0 }
 0x139   : > { %v897_v14 = vpop.f32.mrf.mxu1 }
 0x13a   : > { %v898_v42 = vadd.f32 %v897_v14, %v811_v36 }
 0x13b   : > { %v2032_v40 = vpop.f32.mrf.mxu1 }
 0x13c   : > { %v902_v61 = vmul.f32 0.70710677, %v898_v42  ;;  %v901_v19 = vmul.f32 0.5, %v898_v42 }
 0x13e   : > { %2253 = verf.f32 %v902_v61 }
 0x14b   : > { %v2254_v48 = vpop.eup %2253 }
 0x14c   : > { %v904_v27 = vadd.f32 1.0, %v2254_v48 }
 0x14e   : > { %v905_v38 = vmul.f32 %v904_v27, %v901_v19 }
 0x150   : > { %v2981_v6 = vand.u32 4294901760, %v905_v38 }
 0x152   : > { %v2984_v50 = vsub.f32 %v905_v38, %v2981_v6  ;;  %2101 = vmatmul.mubr.f32.vlgmr.msra.gmra.mxu1 %v2981_v6 }
 0x153   : > { %2139 = vmatpush3.msra.mxu1 %v2741_v5  ;;  %2170 = vmatprep.mubr.msk.f32.mxu1 %vm2264_vm0, %v2263_v3 }
 0x154   : > { %2140 = vmatprep.subr.mxu1 %v2263_v3  ;;  %v996_v61 = vand.u32 4294901760, %v2984_v50 }
 0x155   : > { %2141 = vmatpush3.msra.mxu1 %v2749_v11 }
 0x156   : > { %2142 = vmatprep.subr.mxu1 %v2263_v3  ;;  %v997_v27 = vsub.f32 %v2984_v50, %v996_v61 }
 0x157   : > { %2143 = vmatpush3.msra.mxu1 %v2760_v17 }
 0x158   : > { %2144 = vmatprep.subr.mxu1 %v2263_v3  ;;  %v998_v42 = vand.u32 4294901760, %v997_v27 }
 0x159   : > { %2145 = vmatpush3.msra.mxu1 %v2774_v23 }
 0x15a   : > { %2146 = vmatprep.subr.mxu1 %v2263_v3  ;;  %2066 = vmatmul.mubr.f32.vlgmr.msra.gmra.mxu0 %v998_v42 }
 0x15b   : > { %2104 = vmatpush3.msra.mxu0 %v2747_v10  ;;  %2147 = vmatpush3.msra.mxu1 %v2789_v30  ;;  %v3168_v10 = vand.u32 4294901760, %v2888_v39 }
 0x15c   : > { %2105 = vmatprep.subr.mxu0 %v2263_v3  ;;  %2148 = vmatprep.subr.mxu1 %v2263_v3 }
 0x15d   : > { %2106 = vmatpush3.msra.mxu0 %v2758_v16  ;;  %2149 = vmatpush3.msra.mxu1 %v2799_v45  ;;  %v3171_v16 = vand.u32 4294901760, %v2934_v62 }
 0x15e   : > { %2107 = vmatprep.subr.mxu0 %v2263_v3  ;;  %2150 = vmatprep.subr.mxu1 %v2263_v3 }
 0x15f   : > { %2108 = vmatpush3.msra.mxu0 %v2772_v22  ;;  %2151 = vmatpush3.msra.mxu1 %v2815_v57 }
 0x160   : > { %2109 = vmatprep.subr.mxu0 %v2263_v3  ;;  %2152 = vmatprep.subr.mxu1 %v2263_v3 }
 0x161   : > { %2110 = vmatpush3.msra.mxu0 %v2786_v29  ;;  %2153 = vmatpush3.msra.mxu1 %v2828_v8 }
 0x162   : > { %2111 = vmatprep.subr.mxu0 %v2263_v3  ;;  %2154 = vmatprep.subr.mxu1 %v2263_v3 }
 0x163   : > { %2112 = vmatpush3.msra.mxu0 %v2803_v46  ;;  %2155 = vmatpush3.msra.mxu1 %v2846_v37 }
 0x164   : > { %2113 = vmatprep.subr.mxu0 %v2263_v3  ;;  %2156 = vmatprep.subr.mxu1 %v2263_v3 }
 0x165   : > { %2114 = vmatpush3.msra.mxu0 %v2813_v55  ;;  %2157 = vmatpush3.msra.mxu1 %v2862_v56  ;;  %v1616_v55 = vld [vmem:[%s3157_s4] ss:$0 sm:$0xff] }
 0x166   : > { %2115 = vmatprep.subr.mxu0 %v2263_v3  ;;  %2158 = vmatprep.subr.mxu1 %v2263_v3 }
 0x167   : > { %2116 = vmatpush3.msra.mxu0 %v2826_v2  ;;  %2159 = vmatpush3.msra.mxu1 %v2873_v7 }
 0x168   : > { %2117 = vmatprep.subr.mxu0 %v2263_v3  ;;  %2160 = vmatprep.subr.mxu1 %v2263_v3 }
 0x169   : > { %2118 = vmatpush3.msra.mxu0 %v2844_v32  ;;  %2161 = vmatpush3.msra.mxu1 %v2890_v41 }
 0x16a   : > { %2119 = vmatprep.subr.mxu0 %v2263_v3  ;;  %2162 = vmatprep.subr.mxu1 %v2263_v3 }
 0x16b   : > { %2120 = vmatpush3.msra.mxu0 %v2859_v54  ;;  %2163 = vmatpush3.msra.mxu1 %v2903_v18 }
 0x16c   : > { %2121 = vmatprep.subr.mxu0 %v2263_v3  ;;  %2164 = vmatprep.subr.mxu1 %v2263_v3 }
 0x16d   : > { %2122 = vmatpush3.msra.mxu0 %v2877_v9  ;;  %2165 = vmatpush3.msra.mxu1 %v2921_v35 }
 0x16e   : > { %2123 = vmatprep.subr.mxu0 %v2263_v3  ;;  %2166 = vmatprep.subr.mxu1 %v2263_v3 }
 0x16f   : > { %2124 = vmatpush3.msra.mxu0 %v2888_v39  ;;  %2167 = vmatpush3.msra.mxu1 %v2937_v13 }
 0x170   : > { %2125 = vmatprep.subr.mxu0 %v2263_v3  ;;  %2168 = vmatprep.subr.mxu1 %v2263_v3 }
 0x171   : > { %2126 = vmatpush3.msra.mxu0 %v2901_v12  ;;  %2169 = vmatpush3.msra.mxu1 %v2948_v44 }
 0x172   : > { %2127 = vmatprep.subr.mxu0 %v2263_v3  ;;  %2171 = vmatmul.mubr.f32.vlgmr.msra.gmra.mxu1 %v996_v61 }
 0x173   : > { %2208 = vmatprep.subr.mxu1 %v2263_v3  ;;  %2128 = vmatpush3.msra.mxu0 %v2919_v34 }
 0x174   : > { %2209 = vmatpush3.msra.mxu1 %v2741_v5  ;;  %2129 = vmatprep.subr.mxu0 %v2263_v3  ;;  %v3167_v5 = vand.u32 4294901760, %v2877_v9 }
 0x175   : > { %2210 = vmatprep.subr.mxu1 %v2263_v3  ;;  %2130 = vmatpush3.msra.mxu0 %v2934_v62 }
 0x176   : > { %2211 = vmatpush3.msra.mxu1 %v2749_v11  ;;  %2131 = vmatprep.subr.mxu0 %v2263_v3  ;;  %v3169_v11 = vand.u32 4294901760, %v2901_v12 }
 0x177   : > { %2212 = vmatprep.subr.mxu1 %v2263_v3  ;;  %2132 = vmatpush3.msra.mxu0 %v2952_v49 }
 0x178   : > { %2213 = vmatpush3.msra.mxu1 %v2760_v17  ;;  %2133 = vmatprep.subr.mxu0 %v2263_v3  ;;  %v3172_v17 = vand.u32 4294901760, %v2952_v49 }
 0x179   : > { %2214 = vmatprep.subr.mxu1 %v2263_v3  ;;  %2134 = vmatpush3.msra.mxu0 %v2960_v0 }
 0x17a   : > { %2135 = vmatprep.mubr.msk.f32.mxu0 %vm2264_vm0, %v2263_v3  ;;  %2215 = vmatpush3.msra.mxu1 %v2774_v23 }
 0x17b   : > { %2136 = vmatmul.mubr.f32.vlgmr.msra.gmra.mxu0 %v2984_v50  ;;  %2173 = vmatprep.subr.mxu0 %v2263_v3 }
 0x17c   : > { %2216 = vmatprep.subr.mxu1 %v2263_v3  ;;  %2174 = vmatpush3.msra.mxu0 %v1007_v15  ;;  %v3170_v15 = vand.u32 4294901760, %v2919_v34 }
 0x17d   : > { %2217 = vmatpush3.msra.mxu1 %v2789_v30  ;;  %2175 = vmatprep.subr.mxu0 %v2263_v3 }
 0x17e   : > { %2218 = vmatprep.subr.mxu1 %v2263_v3  ;;  %2176 = vmatpush3.msra.mxu0 %v1014_v21  ;;  %v3173_v21 = vand.u32 4294901760, %v2960_v0 }
 0x17f   : > { %2219 = vmatpush3.msra.mxu1 %v2799_v45  ;;  %2177 = vmatprep.subr.mxu0 %v2263_v3 }
 0x180   : > { %2220 = vmatprep.subr.mxu1 %v2263_v3  ;;  %2178 = vmatpush3.msra.mxu0 %v1021_v28 }
 0x181   : > { %2221 = vmatpush3.msra.mxu1 %v2815_v57  ;;  %2179 = vmatprep.subr.mxu0 %v2263_v3 }
 0x182   : > { %2222 = vmatprep.subr.mxu1 %v2263_v3  ;;  %2180 = vmatpush3.msra.mxu0 %v1028_v43 }
 0x183   : > { %2223 = vmatpush3.msra.mxu1 %v2828_v8  ;;  %2181 = vmatprep.subr.mxu0 %v2263_v3 }
 0x184   : > { %2224 = vmatprep.subr.mxu1 %v2263_v3  ;;  %2182 = vmatpush3.msra.mxu0 %v1035_v59 }
 0x185   : > { %2225 = vmatpush3.msra.mxu1 %v2846_v37  ;;  %2183 = vmatprep.subr.mxu0 %v2263_v3 }
 0x186   : > { %2226 = vmatprep.subr.mxu1 %v2263_v3  ;;  %2184 = vmatpush3.msra.mxu0 %v1042_v63 }
 0x187   : > { %2227 = vmatpush3.msra.mxu1 %v2862_v56  ;;  %2185 = vmatprep.subr.mxu0 %v2263_v3 }
 0x188   : > { %2228 = vmatprep.subr.mxu1 %v2263_v3  ;;  %2186 = vmatpush3.msra.mxu0 %v1049_v31 }
 0x189   : > { %2229 = vmatpush3.msra.mxu1 %v2873_v7  ;;  %2187 = vmatprep.subr.mxu0 %v2263_v3 }
 0x18a   : > { %2230 = vmatprep.subr.mxu1 %v2263_v3  ;;  %2188 = vmatpush3.msra.mxu0 %v1056_v52 }
 0x18b   : > { %2231 = vmatpush3.msra.mxu1 %v2890_v41  ;;  %2189 = vmatprep.subr.mxu0 %v2263_v3 }
 0x18c   : > { %2232 = vmatprep.subr.mxu1 %v2263_v3  ;;  %2190 = vmatpush3.msra.mxu0 %v1063_v1 }
 0x18d   : > { %2233 = vmatpush3.msra.mxu1 %v2903_v18  ;;  %2191 = vmatprep.subr.mxu0 %v2263_v3 }
 0x18e   : > { %2234 = vmatprep.subr.mxu1 %v2263_v3  ;;  %2192 = vmatpush3.msra.mxu0 %v3167_v5 }
 0x18f   : > { %2235 = vmatpush3.msra.mxu1 %v2921_v35  ;;  %2193 = vmatprep.subr.mxu0 %v2263_v3 }
 0x190   : > { %2236 = vmatprep.subr.mxu1 %v2263_v3  ;;  %2194 = vmatpush3.msra.mxu0 %v3168_v10 }
 0x191   : > { %2237 = vmatpush3.msra.mxu1 %v2937_v13  ;;  %2195 = vmatprep.subr.mxu0 %v2263_v3 }
 0x192   : > { %2238 = vmatprep.subr.mxu1 %v2263_v3  ;;  %2196 = vmatpush3.msra.mxu0 %v3169_v11 }
 0x193   : > { %2239 = vmatpush3.msra.mxu1 %v2948_v44  ;;  %2240 = vmatprep.mubr.msk.f32.mxu1 %vm2264_vm0, %v2263_v3 }
 0x194   : > { %2197 = vmatprep.subr.mxu0 %v2263_v3  ;;  %2241 = vmatmul.mubr.f32.vlgmr.msra.gmra.mxu1 %v2981_v6 }
 0x195   : > { %2198 = vmatpush3.msra.mxu0 %v3170_v15  ;;  %2205 = vmatprep.mubr.msk.f32.mxu0 %vm2264_vm0, %v2263_v3 }
 0x196   : > { %2199 = vmatprep.subr.mxu0 %v2263_v3 }
 0x197   : > { %2200 = vmatpush3.msra.mxu0 %v3171_v16 }
 0x198   : > { %2201 = vmatprep.subr.mxu0 %v2263_v3 }
 0x199   : > { %2202 = vmatpush3.msra.mxu0 %v3172_v17 }
 0x19a   : > { %2203 = vmatprep.subr.mxu0 %v2263_v3 }
 0x19b   : > { %2204 = vmatpush3.msra.mxu0 %v3173_v21 }
 0x19c   : > { %2206 = vmatmul.mubr.f32.vlgmr.msra.gmra.mxu0 %v2981_v6 }
 0x212   : > { %v1151_v22 = vpop.f32.mrf.mxu1 }
 0x214   : > { %v2102_v23 = vpop.f32.mrf.mxu1 }
 0x21a   : > { %v1000_v28 = vpop.f32.mrf.mxu0 }
 0x21b   : > { %v1001_v57 = vadd.f32 %v1616_v55, %v1000_v28 }
 0x21c   : > { %v2067_v29 = vpop.f32.mrf.mxu0 }
 0x21d   : > { %v1152_v59 = vadd.f32 %v1151_v22, %v1001_v57 }
 0x232   : > { %v1344_v30 = vpop.f32.mrf.mxu1 }
 0x234   : > { %v2172_v43 = vpop.f32.mrf.mxu1 }
 0x23b   : > { %v1255_v45 = vpop.f32.mrf.mxu0 }
 0x23c   : > { %v1256_v2 = vadd.f32 %v1255_v45, %v1152_v59 }
 0x23d   : > { %v2137_v46 = vpop.f32.mrf.mxu0 }
 0x23e   : > { %v1345_v8 = vadd.f32 %v1344_v30, %v1256_v2 }
 0x254   : > { %v1550_v3 = vpop.f32.mrf.mxu1 }
 0x256   : > { %v2242_v63 = vpop.f32.mrf.mxu1 }
 0x25c   : > { %v1463_v31 = vpop.f32.mrf.mxu0 }
 0x25d   : > { %v1464_v32 = vadd.f32 %v1463_v31, %v1345_v8 }
 0x25e   : > { %v2207_v37 = vpop.f32.mrf.mxu0 }
 0x25f   : > { %v1551_v52 = vadd.f32 %v1550_v3, %v1464_v32 }
 0x261   : > { %1554 = vst [vmem:[%s219_s28] sm:$0xff] %v1551_v52 }
 0x262 PF: > { %s15_s18 = sadd.s32 1, %s2261_s18  }
 0x263   : > { %p12_p4 = scmp.ge.s32.totalorder %s15_s18, 4  }
 0x265   :  { %14 = sbr.rel (!%p12_p4) target bundleno = 1 (0x1), region = 70 }

</bundles_post_ra>
